<compile_context>
chip_gen: v6e
topology: v6e:2x2x1
jax: 0.10.0
libtpu: 0.0.40
codegen_flags: <defaults>
</compile_context>

<pallas_src>
import jax
import jax.numpy as jnp
from jax.experimental import pallas as pl
from jax.experimental.pallas import tpu as pltpu


# Below this many bytes in the *output* slice, a plain lax.slice (fusable, no
# custom-call / fusion-barrier overhead) is strictly cheaper than any kernel.
_PALLAS_MIN_BYTES = 1 << 20

# Max number of concurrent batch-chunk DMAs when the Pallas path is taken.
#   v6e (~1.3-1.4 TB/s HBM): 2-4 outstanding copies saturate it.
#   v7x (~3.2 TB/s HBM):     raise to ~8 for large B.
#   v5e (~0.8 TB/s HBM):     1-2 is enough.
_DEFAULT_MAX_DMAS = 4


def _make_slice_copy_kernel(c_off, batch_chunks):
    """Kernel factory: copy channel `c_off` of a (B, C, HW) HBM array into a
    (B, HW) HBM output, one concurrent DMA per batch chunk.

    batch_chunks: static list of (start, size) pairs along the batch axis.
    """

    def kernel(x_hbm, o_hbm, sems):
        # Start every chunk's HBM->HBM DMA first, then wait for all of them, so
        # the copies are in flight concurrently (more outstanding transactions,
        # per the v7x advice; len(batch_chunks) is capped for v6e/v5e).
        copies = []
        for i, (b0, bs) in enumerate(batch_chunks):
            cp = pltpu.make_async_copy(
                # (bs, HW) lane-dense strided window: channel c_off of batches
                # [b0, b0+bs).  The integer index squeezes the channel dim so
                # both sides of the DMA are rank-2 with a 128-multiple last dim.
                x_hbm.at[pl.ds(b0, bs), c_off, :],
                o_hbm.at[pl.ds(b0, bs), :],
                sems.at[i],
            )
            cp.start()
            copies.append(cp)
        for cp in copies:
            cp.wait()

    return kernel


def _pallas_channel_slice(x3, c_off, num_dmas=None):
    """Materialize x3[:, c_off, :] (shape (B, HW)) with a Pallas HBM->HBM copy.

    x3 should be shaped (B, C, HW) with HW lane-dense (multiple of 128 when
    possible): callers that keep activations in this shape pay no relayout
    before the kernel.  No VMEM staging, no grid — just DMA descriptors, so the
    copy is limited only by HBM bandwidth.
    """
    B, C, HW = x3.shape
    copy_bytes = B * HW * x3.dtype.itemsize
    if num_dmas is None:
        num_dmas = 1 if copy_bytes < _PALLAS_MIN_BYTES else _DEFAULT_MAX_DMAS
    num_dmas = max(1, min(int(num_dmas), B))

    # Static, even-ish chunking of the batch axis.
    base, rem = divmod(B, num_dmas)
    chunks, start = [], 0
    for i in range(num_dmas):
        size = base + (1 if i < rem else 0)
        if size == 0:
            continue
        chunks.append((start, size))
        start += size

    return pl.pallas_call(
        _make_slice_copy_kernel(int(c_off), chunks),
        out_shape=jax.ShapeDtypeStruct((B, HW), x3.dtype),
        in_specs=[pl.BlockSpec(memory_space=pl.ANY)],
        out_specs=pl.BlockSpec(memory_space=pl.ANY),
        scratch_shapes=[pltpu.SemaphoreType.DMA((len(chunks),))],
    )(x3)


def identity_forward(x, flatten=False, slice_dim=None, *, use_pallas=None,
                     num_dmas=None):
    """Pallas/JAX implementation of cadgan Identity.forward.

    x:          (B, C, H, W) array (NCHW, same as PyTorch).
    slice_dim:  if not None, keep only channel [slice_dim : slice_dim + 1].
                Must be a static Python int (it is an nn.Module attribute).
    flatten:    if True, return (B, C_out*H*W) instead of (B, C_out, H, W).
    use_pallas: None  -> auto (Pallas only when the slice is large enough that a
                         standalone materialized copy beats custom-call cost);
                False -> plain lax.slice (fusable into downstream consumers);
                True  -> force the Pallas DMA-copy kernel.
    """
    B, C, H, W = x.shape

    if slice_dim is None:
        # Pure identity: never launch a kernel.
        return x.reshape(B, -1) if flatten else x

    c_off = int(slice_dim)  # static by construction (module attribute)
    if not (0 <= c_off < C):
        raise ValueError(f"slice_dim={c_off} out of range for C={C}")

    if C == 1:
        # The slice is the whole tensor -> identity again, no copy needed.
        return x.reshape(B, -1) if flatten else x

    slice_bytes = B * H * W * x.dtype.itemsize
    if use_pallas is None:
        use_pallas = slice_bytes >= _PALLAS_MIN_BYTES

    if not use_pallas:
        # Preferred path: let XLA fuse the slice into whatever consumes it.
        y = jax.lax.slice_in_dim(x, c_off, c_off + 1, axis=1)  # (B, 1, H, W)
        return y.reshape(B, -1) if flatten else y

    # Pallas path: materialized, lane-dense slice via concurrent HBM->HBM DMAs.
    # NOTE: if the caller already holds x as (B, C, H*W) this reshape is free;
    # coming from NCHW it is a one-off relayout paid only when a standalone
    # copy is explicitly requested.
    x3 = x.reshape(B, C, H * W)
    y2 = _pallas_channel_slice(x3, c_off, num_dmas=num_dmas)   # (B, H*W)
    return y2 if flatten else y2.reshape(B, 1, H, W)


if __name__ == "__main__":
    key = jax.random.PRNGKey(0)
    x = jax.random.normal(key, (2, 4, 16, 16), dtype=jnp.float32)
    B, C, H, W = x.shape

    # 1) Pure identity (no kernel).
    y0 = identity_forward(x, flatten=False, slice_dim=None)
    jax.block_until_ready(y0)
    assert y0.shape == (B, C, H, W)
    assert bool(jnp.allclose(y0, x))

    # 2) Flatten-only (handled by XLA, no kernel).
    y1 = identity_forward(x, flatten=True, slice_dim=None)
    jax.block_until_ready(y1)
    assert y1.shape == (B, C * H * W)
    assert bool(jnp.allclose(y1, x.reshape(B, -1)))

    # 3) Channel slice, auto path (tiny slice -> fusable lax.slice, no kernel).
    y2 = identity_forward(x, flatten=False, slice_dim=2)
    jax.block_until_ready(y2)
    assert y2.shape == (B, 1, H, W)
    assert bool(jnp.allclose(y2, x[:, 2:3, :, :]))

    # 4) Channel slice + flatten, forced Pallas kernel (single DMA): the kernel
    #    writes the lane-dense (B, H*W) result directly, no post-reshape.
    y3 = identity_forward(x, flatten=True, slice_dim=1, use_pallas=True)
    jax.block_until_ready(y3)
    assert y3.shape == (B, H * W)
    assert bool(jnp.allclose(y3, x[:, 1:2, :, :].reshape(B, -1)))

    # 5) Channel slice (NCHW out), forced Pallas kernel with 2 concurrent DMAs.
    y4 = identity_forward(x, flatten=False, slice_dim=2, use_pallas=True,
                          num_dmas=2)
    jax.block_until_ready(y4)
    assert y4.shape == (B, 1, H, W)
    assert bool(jnp.allclose(y4, x[:, 2:3, :, :]))

    # 6) Low-level kernel on an already lane-dense (B, C, H*W) input
    #    (no wrapper reshape at all), 2 concurrent DMAs.
    x3 = x.reshape(B, C, H * W)
    y5 = _pallas_channel_slice(x3, 3, num_dmas=2)
    jax.block_until_ready(y5)
    assert y5.shape == (B, H * W)
    assert bool(jnp.allclose(y5, x3[:, 3, :]))

    print("KERNEL_OK")
</pallas_src>

<mosaic_0001>
module attributes {stable_mosaic.version = 11 : i64} {
  func.func @kernel(%arg0: memref<2x4x256xf32, #tpu.memory_space<any>>, %arg1: memref<2x256xf32, #tpu.memory_space<any>>, %arg2: memref<1x!tpu.dma_semaphore, #tpu.memory_space<semaphore_mem>>) attributes {dimension_semantics = [], scalar_prefetch = 0 : i64, scratch_operands = 1 : i64, tpu.core_type = #tpu.core_type<tc>} {
    %c1_i32 = arith.constant 1 : i32
    %c0_i32 = arith.constant 0 : i32
    %c0_i32_0 = arith.constant 0 : i32
    %c0_i32_1 = arith.constant 0 : i32
    %0 = tpu.memref_slice %arg0[%c0_i32_0, %c1_i32, %c0_i32_1] : memref<2x4x256xf32, #tpu.memory_space<any>> -> memref<2x1x256xf32, #tpu.memory_space<any>>
    %1 = tpu.memref_squeeze %0 : memref<2x1x256xf32, #tpu.memory_space<any>> -> memref<2x256xf32, #tpu.memory_space<any>>
    %c0_i32_2 = arith.constant 0 : i32
    %c0_i32_3 = arith.constant 0 : i32
    %2 = tpu.memref_slice %arg1[%c0_i32_2, %c0_i32_3] : memref<2x256xf32, #tpu.memory_space<any>> -> memref<2x256xf32, #tpu.memory_space<any>>
    %3 = tpu.memref_slice %arg2[%c0_i32] : memref<1x!tpu.dma_semaphore, #tpu.memory_space<semaphore_mem>> -> memref<1x!tpu.dma_semaphore, #tpu.memory_space<semaphore_mem>>
    %4 = tpu.memref_squeeze %3 : memref<1x!tpu.dma_semaphore, #tpu.memory_space<semaphore_mem>> -> memref<!tpu.dma_semaphore, #tpu.memory_space<semaphore_mem>>
    tpu.enqueue_dma source(%1 : memref<2x256xf32, #tpu.memory_space<any>>) target(%2 : memref<2x256xf32, #tpu.memory_space<any>>) target_semaphore(%4 : memref<!tpu.dma_semaphore, #tpu.memory_space<semaphore_mem>>)
    %c1_i32_4 = arith.constant 1 : i32
    %c0_i32_5 = arith.constant 0 : i32
    %c0_i32_6 = arith.constant 0 : i32
    %c0_i32_7 = arith.constant 0 : i32
    %5 = tpu.memref_slice %arg0[%c0_i32_6, %c1_i32_4, %c0_i32_7] : memref<2x4x256xf32, #tpu.memory_space<any>> -> memref<2x1x256xf32, #tpu.memory_space<any>>
    %6 = tpu.memref_squeeze %5 : memref<2x1x256xf32, #tpu.memory_space<any>> -> memref<2x256xf32, #tpu.memory_space<any>>
    %c0_i32_8 = arith.constant 0 : i32
    %c0_i32_9 = arith.constant 0 : i32
    %7 = tpu.memref_slice %arg1[%c0_i32_8, %c0_i32_9] : memref<2x256xf32, #tpu.memory_space<any>> -> memref<2x256xf32, #tpu.memory_space<any>>
    %8 = tpu.memref_slice %arg2[%c0_i32_5] : memref<1x!tpu.dma_semaphore, #tpu.memory_space<semaphore_mem>> -> memref<1x!tpu.dma_semaphore, #tpu.memory_space<semaphore_mem>>
    %9 = tpu.memref_squeeze %8 : memref<1x!tpu.dma_semaphore, #tpu.memory_space<semaphore_mem>> -> memref<!tpu.dma_semaphore, #tpu.memory_space<semaphore_mem>>
    tpu.wait_dma2 semaphore(%9 : memref<!tpu.dma_semaphore, #tpu.memory_space<semaphore_mem>>) src(%6 : memref<2x256xf32, #tpu.memory_space<any>>) dst(%7 : memref<2x256xf32, #tpu.memory_space<any>>)
    return
  }
}

</mosaic_0001>

<bundles_post_ra>
// kernel: tpu_custom_call.1
= control target key start
LH: loop header
LB: loop body
LE: loop exit
PB: predicated region body
PF: predicated region fallthrough
CT: control target
= control target key end

     0   :  { %s47_s9 = smov 64   ;;  %s48_s10 = smov 32   ;;  %s72_s0 = inlined_call_operand.hbm [shape: f32[2,4,256], index: 0, kind: input, shape index: {}]   ;;  %s73_s1 = inlined_call_operand.hbm [shape: f32[2,256], index: 1, kind: output, shape index: {}]  }
   0x1   :  { %s6_s8 = scalar_lea.hbm %s72_s0, 16  ;;  %13 = sst [smem:[#allocation4]] %s47_s9 }
   0x2   :  { %15 = sst [smem:[#allocation4 + $0x1]] %s48_s10  ;;  %s49_s11 = smov 2  }
   0x3   :  { %17 = sst [smem:[#allocation4 + $0x2]] %s49_s11  ;;  %s50_s12 = smov 128  }
   0x4   :  { %19 = sst [smem:[#allocation4 + $0x3]] %s50_s12  ;;  %s51_s13 = smov 16  }
   0x5   :  { %21 = sst [smem:[#allocation4 + $0x4]] %s51_s13  ;;  %s52_s14 = smov 1  }
   0x6   :  { %23 = sst [smem:[#allocation4 + $0x5]] %s52_s14  ;;  %s53_s15 = smov [#allocation2]  }
   0x7   :  { %s54_s16 = smov 131072   ;;  %s55_s17 = smov 0  }
   0x8   :  { %25 = dma.general %s6_s8, 64, %s73_s1, %s53_s15, %s54_s16, [#allocation4], %s55_s17, 0  }
   0x9   :  { %45 = dma.done.wait [#allocation2], 64 }
   0xa   :  { %46 = vsyncadd [#allocation2], 4294967232 }
   0xb   :  { %29 = vsyncmov [#allocation2] }
   0xe   :  { %s30_s0 = vpop.sfrf %29 }
   0xf   :  { %p35_p0 = scmp.ne.s32.totalorder %s30_s0, 0 }
  0x11   :  { %34 = shalt.err (%p35_p0)  }

</bundles_post_ra>
